<compile_context>
chip_gen: v7x
topology: tpu7x:2x2x1
jax: 0.10.0
libtpu: 0.0.40
codegen_flags: <defaults>
</compile_context>

<pallas_src>
import math

import jax
import jax.numpy as jnp
from jax.experimental import pallas as pl
from jax.experimental.pallas import tpu as pltpu


def _round_up(x, m):
    return ((x + m - 1) // m) * m


_LANE = 128      # last block dim must be a multiple of this (or the full dim)
_SUBLANE = 8     # second-minor quantum
_TILE_CAP = 512  # 512-wide tiles sit near the HBM roofline and fit every VMEM budget


def _choose_tile(size, quantum, cap=_TILE_CAP):
    """Padding-minimizing tile pick (perf-review over-padding fix).

    Whole (quantum-rounded) dim if it fits under `cap`; otherwise the multiple-of-128
    tile <= cap that minimizes round_up(size, tile), ties broken toward larger tiles."""
    q = _round_up(size, quantum)
    if q <= cap:
        return q
    best_t, best_pad = _LANE, _round_up(size, _LANE)
    t = 2 * _LANE
    while t <= cap:
        p = _round_up(size, t)
        if p <= best_pad:           # ties -> larger tile (fewer grid steps)
            best_t, best_pad = t, p
        t += _LANE
    return best_t


def _split_for_two_tiles(total, tile, quantum):
    """v7x megacore helper: if an axis has a single tile, return the largest
    multiple-of-`quantum` divisor of `total` that yields >= 2 tiles; else keep `tile`."""
    if total // tile >= 2:
        return tile
    d = (total // 2) // quantum * quantum
    while d >= quantum:
        if total % d == 0:
            return d
        d -= quantum
    return tile


# ----------------------------- Pallas kernels -----------------------------

def _linear_kernel(x_ref, wt_ref, b_ref, o_ref, acc_ref):
    """Tiled y = x @ W^T + b.  bf16 MXU feed, f32 accumulation across the K grid axis."""
    @pl.when(pl.program_id(2) == 0)
    def _():
        acc_ref[...] = jnp.zeros_like(acc_ref)

    acc_ref[...] += jnp.dot(x_ref[...], wt_ref[...],
                            preferred_element_type=jnp.float32)

    @pl.when(pl.program_id(2) == pl.num_programs(2) - 1)
    def _():
        o_ref[...] = (acc_ref[...] + b_ref[...]).astype(o_ref.dtype)


def _linear_lora_kernel(x_ref, wt_ref, b_ref, at_ref, bts_ref, o_ref,
                        acc_ref, low_ref):
    """Fused y = x @ W^T + b + (x @ A^T) @ (s*B^T), grid (M, N, K), K innermost.

    * x @ A^T runs only on the first N tile (j == 0); the (tm, rp) f32 low-rank scratch
      persists across the j sweep of the same M tile, so j > 0 epilogues reuse it.
      Correct because the j axis is declared "arbitrary" (executed in order per core).
    * at_ref holds the full (Kp, rp) A^T resident in VMEM; the per-k slice is in-kernel.
    * s*B^T is bf16 and low is cast to bf16, so the epilogue dot is a single MXU pass.
    """
    j = pl.program_id(1)
    k = pl.program_id(2)
    tk = x_ref.shape[1]

    @pl.when(k == 0)
    def _():
        acc_ref[...] = jnp.zeros_like(acc_ref)

    x = x_ref[...]
    acc_ref[...] += jnp.dot(x, wt_ref[...], preferred_element_type=jnp.float32)

    @pl.when(jnp.logical_and(j == 0, k == 0))
    def _():
        low_ref[...] = jnp.zeros_like(low_ref)

    @pl.when(j == 0)
    def _():
        a_blk = at_ref[pl.ds(pl.multiple_of(k * tk, tk), tk), :]
        low_ref[...] += jnp.dot(x, a_blk, preferred_element_type=jnp.float32)

    @pl.when(k == pl.num_programs(2) - 1)
    def _():
        lora = jnp.dot(low_ref[...].astype(bts_ref.dtype), bts_ref[...],
                       preferred_element_type=jnp.float32)
        o_ref[...] = (acc_ref[...] + b_ref[...] + lora).astype(o_ref.dtype)


# --------------------- one-time parameter preparation ----------------------

def prepare_linear_params(weight, bias, lora=None, *, fold_lora=False,
                          compute_dtype=jnp.bfloat16):
    """Hoisted out of the hot path: transpose, fold scaling, pad to tile multiples,
    cast weights to the MXU compute dtype.  Call once at load time, not per forward."""
    dout, din = weight.shape
    tk = _choose_tile(din, _LANE)
    tn = _choose_tile(dout, _LANE)
    Kp, Np = _round_up(din, tk), _round_up(dout, tn)

    if lora is not None and fold_lora:
        # Inference-only: fold the adapter into the base weight -> single well-shaped GEMM.
        weight = weight + lora["scaling"] * (lora["lora_B"] @ lora["lora_A"])
        lora = None

    wt = weight.T
    if (Kp, Np) != (din, dout):
        wt = jnp.pad(wt, ((0, Kp - din), (0, Np - dout)))
    wt = wt.astype(compute_dtype)

    if bias is None:
        b2d = jnp.zeros((1, Np), jnp.float32)
    else:
        b2d = jnp.pad(bias.astype(jnp.float32), (0, Np - dout)).reshape(1, Np)

    params = dict(wt=wt, bias=b2d, din=din, dout=dout, tk=tk, tn=tn,
                  Kp=Kp, Np=Np, compute_dtype=compute_dtype)

    if lora is not None:
        r = lora["lora_A"].shape[0]
        rp = _round_up(r, _LANE)  # lane-align the low-rank intermediate
        at = jnp.pad(lora["lora_A"].T,
                     ((0, Kp - din), (0, rp - r))).astype(compute_dtype)
        # Scaling folded in; bf16 so the epilogue (low @ s*B^T) is a single MXU pass.
        bts = jnp.pad(lora["lora_B"].T * lora["scaling"],
                      ((0, rp - r), (0, Np - dout))).astype(compute_dtype)
        params.update(at=at, bts=bts, rp=rp)
    return params


# ------------------------------- forward -----------------------------------

def our_linear_forward(x, params):
    """x: (batch, seq, in_features) f32.  Returns (batch, seq, out_features) f32."""
    b, s, din = x.shape
    assert din == params["din"]
    dout = params["dout"]
    tk, tn = params["tk"], params["tn"]
    Kp, Np = params["Kp"], params["Np"]
    cdt = params["compute_dtype"]
    has_lora = "at" in params
    rp = params.get("rp", 0)

    M = b * s
    tm = _choose_tile(M, _SUBLANE)
    Mp = _round_up(M, tm)

    # v7x: only 'parallel' axes are sharded across the 2 TensorCores -> when M collapses to
    # a single tile, split N (plain path) or M (LoRA path, whose j axis must stay ordered).
    if Mp // tm == 1:
        if not has_lora:
            tn = _split_for_two_tiles(Np, tn, _LANE)
        elif Mp >= 2 * _LANE:
            tm = _split_for_two_tiles(Mp, tm, _SUBLANE)

    # Skip wrapper-side HBM pad / slice passes when shapes already align (perf review).
    x2d = x.reshape(M, din)
    if x2d.dtype != cdt:
        x2d = x2d.astype(cdt)
    if (Mp, Kp) != (M, din):
        x2d = jnp.pad(x2d, ((0, Mp - M), (0, Kp - din)))

    grid = (Mp // tm, Np // tn, Kp // tk)
    out_shape = jax.ShapeDtypeStruct((Mp, Np), jnp.float32)

    x_spec = pl.BlockSpec((tm, tk), lambda i, j, k: (i, k))
    wt_spec = pl.BlockSpec((tk, tn), lambda i, j, k: (k, j))
    b_spec = pl.BlockSpec((1, tn), lambda i, j, k: (0, j))
    out_spec = pl.BlockSpec((tm, tn), lambda i, j, k: (i, j))

    cdt_b = jnp.dtype(cdt).itemsize
    vmem_need = (2 * tm * tk * cdt_b        # x, double-buffered
                 + 2 * tk * tn * cdt_b      # W^T, double-buffered
                 + 2 * tn * 4               # bias tiles
                 + 2 * tm * tn * 4          # f32 output, double-buffered
                 + tm * tn * 4)             # f32 accumulator
    flops = 2 * Mp * Kp * Np
    bytes_accessed = (x2d.size * cdt_b + params["wt"].size * cdt_b
                      + params["bias"].size * 4 + Mp * Np * 4)
    if has_lora:
        vmem_need += 2 * Kp * rp * cdt_b + 2 * rp * tn * cdt_b + tm * rp * 4
        flops += 2 * Mp * Kp * rp + 2 * Mp * rp * Np   # A-proj runs once (j == 0 only)
        bytes_accessed += params["at"].size * cdt_b + params["bts"].size * cdt_b

    # Tight scoped-VMEM budget: ~3x working set (+1 MiB slack), capped at 64 MiB for v7x.
    vmem_limit = int(min(64 << 20, max(3 * vmem_need + (1 << 20), 8 << 20)))
    cost = pl.CostEstimate(flops=int(flops), transcendentals=0,
                           bytes_accessed=int(bytes_accessed))

    if not has_lora:
        compiler_params = pltpu.CompilerParams(
            dimension_semantics=("parallel", "parallel", "arbitrary"),
            vmem_limit_bytes=vmem_limit)
        y2d = pl.pallas_call(
            _linear_kernel,
            out_shape=out_shape,
            grid_spec=pltpu.PrefetchScalarGridSpec(
                num_scalar_prefetch=0,
                grid=grid,
                in_specs=[x_spec, wt_spec, b_spec],
                out_specs=out_spec,
                scratch_shapes=[pltpu.VMEM((tm, tn), jnp.float32)]),
            compiler_params=compiler_params,
            cost_estimate=cost,
        )(x2d, params["wt"], params["bias"])
    else:
        # A^T fully VMEM-resident: constant block index -> fetched once per kernel.
        at_spec = pl.BlockSpec((Kp, rp), lambda i, j, k: (0, 0))
        bts_spec = pl.BlockSpec((rp, tn), lambda i, j, k: (0, j))
        # j must be 'arbitrary': the j==0-gated low-rank accumulation is only valid if each
        # core sweeps j in order starting at 0 for every M tile it owns.
        compiler_params = pltpu.CompilerParams(
            dimension_semantics=("parallel", "arbitrary", "arbitrary"),
            vmem_limit_bytes=vmem_limit)
        y2d = pl.pallas_call(
            _linear_lora_kernel,
            out_shape=out_shape,
            grid_spec=pltpu.PrefetchScalarGridSpec(
                num_scalar_prefetch=0,
                grid=grid,
                in_specs=[x_spec, wt_spec, b_spec, at_spec, bts_spec],
                out_specs=out_spec,
                scratch_shapes=[pltpu.VMEM((tm, tn), jnp.float32),
                                pltpu.VMEM((tm, rp), jnp.float32)]),
            compiler_params=compiler_params,
            cost_estimate=cost,
        )(x2d, params["wt"], params["bias"], params["at"], params["bts"])

    if (Mp, Np) != (M, dout):
        y2d = y2d[:M, :dout]
    return y2d.reshape(b, s, dout)


# ------------------------ deterministic parameter init ----------------------

def init_params(key, in_features, out_features, r):
    kw, kb, ka, kbb, kx = jax.random.split(key, 5)
    bound_w = 1.0 / math.sqrt(in_features)   # kaiming_uniform_(a=sqrt(5)) on (out, in)
    weight = jax.random.uniform(kw, (out_features, in_features), jnp.float32,
                                -bound_w, bound_w)
    bias = jax.random.uniform(kb, (out_features,), jnp.float32, -bound_w, bound_w)
    lora_A = jax.random.uniform(ka, (r, in_features), jnp.float32, -bound_w, bound_w)
    # Module zero-inits lora_B; use small random values so the LoRA path is exercised.
    lora_B = 0.01 * jax.random.uniform(kbb, (out_features, r), jnp.float32, -1.0, 1.0)
    return weight, bias, lora_A, lora_B, kx


def _references(x, weight, bias, lora_A, lora_B, scaling):
    # References use the same bf16-quantized operands the MXU consumes (f32 accumulation).
    xb = x.astype(jnp.bfloat16).astype(jnp.float32)
    wb = weight.astype(jnp.bfloat16).astype(jnp.float32)
    ab = lora_A.astype(jnp.bfloat16).astype(jnp.float32)
    ref_plain = jnp.einsum("bsi,oi->bso", xb, wb) + bias
    low = jnp.einsum("bsi,ri->bsr", xb, ab)
    ref_lora = ref_plain + scaling * jnp.einsum("bsr,or->bso", low, lora_B)
    return xb, ref_plain, ref_lora


# ----------------------------------- main -----------------------------------

if __name__ == "__main__":
    batch, seq = 2, 8
    in_features, out_features = 32, 32
    r, lora_alpha = 8, 16
    scaling = lora_alpha / r

    key = jax.random.PRNGKey(0)
    weight, bias, lora_A, lora_B, kx = init_params(key, in_features, out_features, r)
    x = jax.random.normal(kx, (batch, seq, in_features), jnp.float32)
    xb, ref_plain, ref_lora = _references(x, weight, bias, lora_A, lora_B, scaling)

    # Path 1: lora_config is None  ->  plain F.linear
    p_plain = prepare_linear_params(weight, bias, lora=None)
    y_plain = jax.block_until_ready(our_linear_forward(x, p_plain))
    assert jnp.allclose(y_plain, ref_plain, atol=2e-3, rtol=2e-3)

    # Path 2: lora_type == 0 (forward_with_node_cv): base + scaling * B(A(x))
    lora = {"lora_A": lora_A, "lora_B": lora_B, "scaling": scaling}
    p_lora = prepare_linear_params(weight, bias, lora=lora)
    y_lora = jax.block_until_ready(our_linear_forward(x, p_lora))
    assert jnp.allclose(y_lora, ref_lora, atol=2e-3, rtol=2e-3)

    # Path 3: inference-time folded adapter (W' = W + s * B @ A) -> single GEMM
    p_fold = prepare_linear_params(weight, bias, lora=lora, fold_lora=True)
    y_fold = jax.block_until_ready(our_linear_forward(x, p_fold))
    w_eff = (weight + scaling * lora_B @ lora_A).astype(jnp.bfloat16).astype(jnp.float32)
    ref_fold = jnp.einsum("bsi,oi->bso", xb, w_eff) + bias
    assert jnp.allclose(y_fold, ref_fold, atol=2e-3, rtol=2e-3)

    # Multi-tile LoRA check: exercises the j==0-gated A-projection (2 N tiles) and
    # the K-accumulated low-rank scratch with an in-kernel A^T slice (5 K tiles).
    in2, out2 = 640, 768
    w2, b2, a2, bb2, kx2 = init_params(jax.random.PRNGKey(1), in2, out2, r)
    x2 = jax.random.normal(kx2, (batch, seq, in2), jnp.float32)
    _, _, ref2 = _references(x2, w2, b2, a2, bb2, scaling)
    p2 = prepare_linear_params(w2, b2,
                               lora={"lora_A": a2, "lora_B": bb2, "scaling": scaling})
    y2 = jax.block_until_ready(our_linear_forward(x2, p2))
    assert jnp.allclose(y2, ref2, atol=2e-3, rtol=2e-3)

    # TODO(synk): forward_with_node_mv (lora_type==1, per-sample einsum-generated weights
    # from user/item hidden states) and training-time lora_dropout are not implemented.
    print("KERNEL_OK")
</pallas_src>

<mosaic_0001>
module attributes {stable_mosaic.version = 11 : i64} {
  func.func @_linear_kernel(%arg0: i32, %arg1: i32, %arg2: i32, %arg3: memref<16x128xbf16, #tpu.memory_space<vmem>>, %arg4: memref<128x128xbf16, #tpu.memory_space<vmem>>, %arg5: memref<1x128xf32, #tpu.memory_space<vmem>>, %arg6: memref<16x128xf32, #tpu.memory_space<vmem>>, %arg7: memref<16x128xf32, #tpu.memory_space<vmem>>) attributes {dimension_semantics = [#tpu.dimension_semantics<parallel>, #tpu.dimension_semantics<parallel>, #tpu.dimension_semantics<arbitrary>], iteration_bounds = array<i64: 1, 1, 1>, scalar_prefetch = 0 : i64, scratch_operands = 1 : i64, tpu.core_type = #tpu.core_type<tc>, window_params = [{transform_indices = @transform_0, window_bounds = array<i64: 16, 128>}, {transform_indices = @transform_1, window_bounds = array<i64: 128, 128>}, {transform_indices = @transform_2, window_bounds = array<i64: 1, 128>}, {transform_indices = @transform_3, window_bounds = array<i64: 16, 128>}]} {
    %c0_i32 = arith.constant 0 : i32
    %0 = arith.cmpi eq, %arg2, %c0_i32 : i32
    %1 = arith.extui %0 : i1 to i32
    %c0_i32_0 = arith.constant 0 : i32
    %2 = arith.cmpi ne, %1, %c0_i32_0 : i32
    scf.if %2 {
      %cst_10 = arith.constant 0.000000e+00 : f32
      %12 = vector.broadcast %cst_10 : f32 to vector<16x128xf32>
      %c0_11 = arith.constant 0 : index
      %c0_12 = arith.constant 0 : index
      %13 = vector.load %arg7[%c0_11, %c0_12] : memref<16x128xf32, #tpu.memory_space<vmem>>, vector<16x128xf32>
      tpu.vector_store %arg7[%c0_11, %c0_12], %12 {strides = array<i32>} : memref<16x128xf32, #tpu.memory_space<vmem>>, vector<16x128xf32>,
    } else {
    }
    %c0 = arith.constant 0 : index
    %c0_1 = arith.constant 0 : index
    %3 = vector.load %arg7[%c0, %c0_1] : memref<16x128xf32, #tpu.memory_space<vmem>>, vector<16x128xf32>
    %c0_2 = arith.constant 0 : index
    %c0_3 = arith.constant 0 : index
    %4 = vector.load %arg3[%c0_2, %c0_3] : memref<16x128xbf16, #tpu.memory_space<vmem>>, vector<16x128xbf16>
    %c0_4 = arith.constant 0 : index
    %c0_5 = arith.constant 0 : index
    %5 = vector.load %arg4[%c0_4, %c0_5] : memref<128x128xbf16, #tpu.memory_space<vmem>>, vector<128x128xbf16>
    %cst = arith.constant dense<0.000000e+00> : vector<16x128xf32>
    %6 = tpu.matmul %4, %5, %cst {dimension_numbers = #tpu.dot_dimension_numbers<[1], [0], [0], [1], [0, 0, 1, 1], [], []>} : vector<16x128xbf16>, vector<128x128xbf16>, vector<16x128xf32> -> vector<16x128xf32>
    %7 = arith.addf %3, %6 : vector<16x128xf32>
    %c0_6 = arith.constant 0 : index
    %c0_7 = arith.constant 0 : index
    %8 = vector.load %arg7[%c0_6, %c0_7] : memref<16x128xf32, #tpu.memory_space<vmem>>, vector<16x128xf32>
    tpu.vector_store %arg7[%c0_6, %c0_7], %7 {strides = array<i32>} : memref<16x128xf32, #tpu.memory_space<vmem>>, vector<16x128xf32>,
    %c0_i32_8 = arith.constant 0 : i32
    %9 = arith.cmpi eq, %arg2, %c0_i32_8 : i32
    %10 = arith.extui %9 : i1 to i32
    %c0_i32_9 = arith.constant 0 : i32
    %11 = arith.cmpi ne, %10, %c0_i32_9 : i32
    scf.if %11 {
      %c0_10 = arith.constant 0 : index
      %c0_11 = arith.constant 0 : index
      %12 = vector.load %arg7[%c0_10, %c0_11] : memref<16x128xf32, #tpu.memory_space<vmem>>, vector<16x128xf32>
      %c0_12 = arith.constant 0 : index
      %c0_13 = arith.constant 0 : index
      %13 = vector.load %arg5[%c0_12, %c0_13] : memref<1x128xf32, #tpu.memory_space<vmem>>, vector<1x128xf32>
      %14 = vector.broadcast %13 : vector<1x128xf32> to vector<16x128xf32>
      %15 = arith.addf %12, %14 : vector<16x128xf32>
      %c0_14 = arith.constant 0 : index
      %c0_15 = arith.constant 0 : index
      %16 = vector.load %arg6[%c0_14, %c0_15] : memref<16x128xf32, #tpu.memory_space<vmem>>, vector<16x128xf32>
      tpu.vector_store %arg6[%c0_14, %c0_15], %15 {strides = array<i32>} : memref<16x128xf32, #tpu.memory_space<vmem>>, vector<16x128xf32>,
    } else {
    }
    return
  }
  func.func @transform_0(%arg0: i32, %arg1: i32, %arg2: i32) -> (i32, i32) {
    %c0_i32 = arith.constant 0 : i32
    return %arg0, %arg2 : i32, i32
  }
  func.func @transform_1(%arg0: i32, %arg1: i32, %arg2: i32) -> (i32, i32) {
    %c0_i32 = arith.constant 0 : i32
    return %arg2, %arg1 : i32, i32
  }
  func.func @transform_2(%arg0: i32, %arg1: i32, %arg2: i32) -> (i32, i32) {
    %c0_i32 = arith.constant 0 : i32
    %c0_i32_0 = arith.constant 0 : i32
    return %c0_i32, %arg1 : i32, i32
  }
  func.func @transform_3(%arg0: i32, %arg1: i32, %arg2: i32) -> (i32, i32) {
    %c0_i32 = arith.constant 0 : i32
    return %arg0, %arg1 : i32, i32
  }
}

</mosaic_0001>

<bundles_post_ra>
// kernel: tpu_custom_call.1
= control target key start
LH: loop header
LB: loop body
LE: loop exit
PB: predicated region body
PF: predicated region fallthrough
CT: control target
= control target key end

     0   :  { %8 = vsyncpa [#allocation4], 0  ;;  %s400_s0 = inlined_call_operand.hbm [shape: bf16[16,128], index: 0, kind: input, shape index: {}]   ;;  %s401_s1 = inlined_call_operand.hbm [shape: bf16[128,128], index: 1, kind: input, shape index: {}]   ;;  %s402_s2 = inlined_call_operand.vmem [shape: f32[1,128], index: 2, kind: input, shape index: {}]   ;;  %s403_s3 = inlined_call_operand.hbm [shape: f32[16,128], index: 3, kind: output, shape index: {}]  }
   0x1   :  { %9 = vsyncpa [#allocation7], 0 }
   0x2   :  { %10 = vsyncpa [#allocation5], 0  ;;  %s332_s12 = smov [#allocation3]   ;;  %s260_s16 = scalar_lea.hbm %s400_s0, 128 }
   0x3   :  { %s16_s13 = sshll.u32 %s332_s12, 4  ;;  %p261_p0 = scmp.ne.s32.totalorder %s400_s0, %s260_s16  ;;  %s17_s13 = int_to_ptr.vmem [resolvable:$true] %s16_s13 }
   0x4   :  { %p264_p1 = scmp.lt.u32.totalorder %s260_s16, %s400_s0 }
   0x6   :  { %p266_p2 = pnand %p264_p1, %p261_p0 }
   0x8   :  { %269 = shalt.err (!%p266_p2)
}
   0x9   :  { %s270_s21 = scalar_lea.vmem %s17_s13, 128  ;;  %p275_p4 = scmp.lt.s32.totalorder %s17_s13, %s17_s13 }
   0xa   :  { %p271_p3 = scmp.ne.s32.totalorder %s17_s13, %s270_s21  ;;  %p276_p5 = scmp.lt.s32.totalorder %s270_s21, %s270_s21 }
   0xc   :  { %p277_p6 = por %p276_p5, %p275_p4 }
   0xe   :  { %p278_p7 = pnand %p277_p6, %p271_p3 }
  0x10   :  { %281 = shalt.err (!%p278_p7)
}
  0x11   :  { %s333_s22 = smov 64   ;;  %s334_s23 = smov 4  }
  0x12   :  { %22 = dma.hbm_to_vmem [thread:$0]  %s400_s0, 128, %s17_s13, [#allocation4], %s333_s22, %s333_s22, %s334_s23  }
  0x13   :  { %s335_s26 = smov [#allocation6]   ;;  %s282_s30 = scalar_lea.hbm %s401_s1, 1024 }
  0x14   :  { %s28_s27 = sshll.u32 %s335_s26, 4  ;;  %p283_p8 = scmp.ne.s32.totalorder %s401_s1, %s282_s30  ;;  %s29_s27 = int_to_ptr.vmem [resolvable:$true] %s28_s27 }
  0x15   :  { %p286_p9 = scmp.lt.u32.totalorder %s282_s30, %s401_s1 }
  0x17   :  { %p288_p10 = pnand %p286_p9, %p283_p8 }
  0x19   :  { %291 = shalt.err (!%p288_p10)
}
  0x1a   :  { %s292_s8 = scalar_lea.vmem %s29_s27, 1024  ;;  %p297_p12 = scmp.lt.s32.totalorder %s29_s27, %s29_s27 }
  0x1b   :  { %p293_p11 = scmp.ne.s32.totalorder %s29_s27, %s292_s8  ;;  %p298_p13 = scmp.lt.s32.totalorder %s292_s8, %s292_s8 }
  0x1d   :  { %p299_p0 = por %p298_p13, %p297_p12 }
  0x1f   :  { %p300_p1 = pnand %p299_p0, %p293_p11 }
  0x21   :  { %303 = shalt.err (!%p300_p1)
}
  0x22   :  { %34 = dma.hbm_to_vmem [thread:$0]  %s401_s1, 1024, %s29_s27, [#allocation7], %s333_s22, %s333_s22, %s334_s23  }
  0x23   :  { %326 = dma.done.wait [#allocation4], 128  }
  0x24   :  { %327 = vsyncadd [#allocation4], 4294967168 }
  0x25   :  { %328 = dma.done.wait [#allocation7], 1024  }
  0x26   :  { %329 = vsyncadd [#allocation7], 4294966272  ;;  %v336_v0 = vmov 0.0   ;;  %vm337_vm0 = vmmov 0   ;;  %v251_v1 = vld [vmem:[#allocation6] sm:$0xff]   ;;  %v252_v2 = vld [vmem:[#allocation6 + $0x8] sm:$0xff]  }
  0x27   :  { %222 = vmatprep.subr.bf16.mxu0 %v336_v0  ;;  %238 = vmatprep.mubr.msk.bf16.mxu0 %vm337_vm0, %v336_v0  ;;  %v253_v3 = vld [vmem:[#allocation6 + $0x10] sm:$0xff]   ;;  %v254_v4 = vld [vmem:[#allocation6 + $0x18] sm:$0xff]   ;;  %v255_v5 = vld [vmem:[#allocation6 + $0x20] sm:$0xff]   ;;  %s338_s11 = smov [#allocation8]  }
  0x28   :  { %223 = vmatpush3.bf16.msra.mxu0 %v251_v1  ;;  %v256_v6 = vld [vmem:[#allocation6 + $0x28] sm:$0xff]   ;;  %v257_v7 = vld [vmem:[#allocation6 + $0x30] sm:$0xff]   ;;  %v258_v8 = vld [vmem:[#allocation6 + $0x38] sm:$0xff]   ;;  %s190_s12 = sshll.u32 %s338_s11, 4  ;;  %s191_s12 = int_to_ptr.vmem [resolvable:$true] %s190_s12 }
  0x29   :  { %224 = vmatprep.subr.bf16.mxu0 %v336_v0  ;;  %v259_v9 = vld [vmem:[#allocation3] sm:$0xff]   ;;  %s304_s13 = scalar_lea.vmem %s191_s12, 256  ;;  %p309_p3 = scmp.lt.s32.totalorder %s191_s12, %s191_s12 }
  0x2a   :  { %v212_v10 = vld [vmem:[%s402_s2] ss:$0 sm:$0xff]  ;;  %p305_p2 = scmp.ne.s32.totalorder %s191_s12, %s304_s13  ;;  %p310_p4 = scmp.lt.s32.totalorder %s304_s13, %s304_s13 }
  0x2c   :  { %225 = vmatpush3.bf16.msra.mxu0 %v252_v2  ;;  %p311_p5 = por %p310_p4, %p309_p3 }
  0x2d   :  { %226 = vmatprep.subr.bf16.mxu0 %v336_v0 }
  0x2e   :  { %p312_p6 = pnand %p311_p5, %p305_p2 }
  0x30   :  { %227 = vmatpush3.bf16.msra.mxu0 %v253_v3 }
  0x31   :  { %228 = vmatprep.subr.bf16.mxu0 %v336_v0 }
  0x34   :  { %229 = vmatpush3.bf16.msra.mxu0 %v254_v4 }
  0x35   :  { %230 = vmatprep.subr.bf16.mxu0 %v336_v0 }
  0x38   :  { %231 = vmatpush3.bf16.msra.mxu0 %v255_v5 }
  0x39   :  { %232 = vmatprep.subr.bf16.mxu0 %v336_v0 }
  0x3c   :  { %233 = vmatpush3.bf16.msra.mxu0 %v256_v6 }
  0x3d   :  { %234 = vmatprep.subr.bf16.mxu0 %v336_v0 }
  0x40   :  { %235 = vmatpush3.bf16.msra.mxu0 %v257_v7 }
  0x41   :  { %236 = vmatprep.subr.bf16.mxu0 %v336_v0 }
  0x44   :  { %237 = vmatpush3.bf16.msra.mxu0 %v258_v8 }
  0x47   :  { %239 = vmatmul.mubr.bf16.vlgmr.msra.gmra.mrb[0].mxu0 %v259_v9 }
 0x11a   :  { %v158_v11 = vpop.f32.mrb[0].mxu0 }
 0x11b   :  { %v181_v12 = vadd.f32 %v212_v10, %v158_v11  ;;  %v240_v13 = vpop.f32.mrb[1].mxu0 }
 0x11c   :  { %v161_v14 = vpop.f32.mrb[2].mxu0 }
 0x11d   :  { %183 = vst [vmem:[#allocation8] sm:$0xff] %v181_v12  ;;  %v182_v15 = vadd.f32 %v212_v10, %v161_v14  ;;  %v241_v16 = vpop.f32.mrb[3].mxu0 }
 0x11f   :  { %184 = vst [vmem:[#allocation8 + $0x8] sm:$0xff] %v182_v15 }
 0x120   :  { %315 = shalt.err (!%p312_p6)
}
 0x121   :  { %s316_s15 = scalar_lea.hbm %s403_s3, 256 }
 0x122   :  { %p317_p7 = scmp.ne.s32.totalorder %s403_s3, %s316_s15  ;;  %p320_p8 = scmp.lt.u32.totalorder %s316_s15, %s403_s3 }
 0x124   :  { %p322_p9 = pnand %p320_p8, %p317_p7 }
 0x126   :  { %325 = shalt.err (!%p322_p9)
}
 0x127   :  { %s339_s20 = smov 128   ;;  %s340_s21 = smov 8  }
 0x128   :  { %196 = dma.vmem_to_hbm [thread:$0]  %s191_s12, 256, %s403_s3, [#allocation5], %s339_s20, %s339_s20, %s340_s21  }
 0x129   :  { %330 = dma.done.wait [#allocation5], 256  }
 0x12a   :  { %331 = vsyncadd [#allocation5], 4294967040 }
 0x12b   :  { %200 = vsyncpa [#allocation4], 1 }
 0x12c   :  { %201 = vsyncpa [#allocation7], 1 }
 0x12d   :  { %202 = vsyncpa [#allocation5], 1 }

</bundles_post_ra>
